<compile_context>
chip_gen: v5e
topology: v5e:2x2
jax: 0.10.0
libtpu: 0.0.40
codegen_flags: <defaults>
</compile_context>

<pallas_src>
import warnings

import jax
import jax.numpy as jnp
import numpy as np
from jax.experimental import pallas as pl
from jax.experimental.pallas import tpu as pltpu


# ----------------------------------------------------------------------------
# Primary path: zero-copy identity via input/output buffer aliasing.
# ----------------------------------------------------------------------------
def _identity_alias_kernel(x_hbm_ref, o_hbm_ref):
    # The output HBM buffer IS the input buffer (input_output_aliases), so the
    # data is already in place: no DMA, no VMEM round trip, no compute.
    # Empty body on purpose — do NOT use pltpu.touch here (add_dependency has
    # no discharge rule and fails interpret mode; the aliasing already carries
    # the dependency).
    del x_hbm_ref, o_hbm_ref


def identity_map(x, *args, **kwargs):
    """Pallas equivalent of IdentityMap.forward(x): returns x unchanged.

    Zero-copy when the input buffer is donated (jax.jit(..., donate_argnums));
    otherwise XLA inserts one defensive copy before the call (outside kernel).
    """
    del args, kwargs
    return pl.pallas_call(
        _identity_alias_kernel,
        out_shape=jax.ShapeDtypeStruct(x.shape, x.dtype),
        in_specs=[pl.BlockSpec(memory_space=pl.ANY)],
        out_specs=pl.BlockSpec(memory_space=pl.ANY),
        input_output_aliases={0: 0},
        # Truthful cost: the kernel itself touches no bytes and does no flops.
        cost_estimate=pl.CostEstimate(flops=0, transcendentals=0, bytes_accessed=0),
    )(x)


# ----------------------------------------------------------------------------
# Secondary path: identity into a *fresh* output buffer (no aliasing),
# implemented as one direct HBM->HBM DMA (no VMEM staging).
# ----------------------------------------------------------------------------
def _identity_dma_kernel(x_hbm_ref, o_hbm_ref, sem):
    # Single whole-array HBM->HBM DMA: no VMEM staging, no vld/vst slot usage.
    cp = pltpu.make_async_copy(x_hbm_ref, o_hbm_ref, sem)
    cp.start()
    cp.wait()


def identity_map_fresh_copy(x, *args, **kwargs):
    """Identity that materializes a fresh output buffer via one HBM->HBM DMA."""
    del args, kwargs
    nbytes = x.size * x.dtype.itemsize
    return pl.pallas_call(
        _identity_dma_kernel,
        out_shape=jax.ShapeDtypeStruct(x.shape, x.dtype),
        in_specs=[pl.BlockSpec(memory_space=pl.ANY)],
        out_specs=pl.BlockSpec(memory_space=pl.ANY),
        scratch_shapes=[pltpu.SemaphoreType.DMA(())],
        # Read + write of the full tensor; lets XLA overlap neighbors correctly.
        cost_estimate=pl.CostEstimate(
            flops=0, transcendentals=0, bytes_accessed=2 * nbytes),
        # NOTE: deliberately no dimension_semantics / core_map — one TC issuing
        # one DMA descriptor is enough; the DMA engines move the bytes.
    )(x)


if __name__ == "__main__":
    # Donation may be reported as unusable on backends/modes that don't honor
    # buffer aliasing (e.g. interpret mode); the result is still correct.
    warnings.filterwarnings(
        "ignore", message="Some donated buffers were not usable")

    key = jax.random.PRNGKey(0)
    # (batch, seq, hidden) as the mm projector receives from the vision tower.
    x = jax.random.normal(key, (2, 8, 32), dtype=jnp.float32)
    x_host = np.asarray(x)  # host copy for verification (x is donated below)

    # Zero-copy aliased path: jit + donate the input so the aliasing is real.
    identity_jit = jax.jit(identity_map, donate_argnums=0)
    y = jax.block_until_ready(identity_jit(x))
    assert y.shape == x_host.shape and y.dtype == x_host.dtype
    assert np.array_equal(np.asarray(y), x_host)

    # Fresh-buffer HBM->HBM DMA path (no aliasing, new output buffer).
    x2 = jnp.asarray(x_host)
    y2 = jax.block_until_ready(identity_map_fresh_copy(x2))
    assert y2.shape == x_host.shape and y2.dtype == x_host.dtype
    assert np.array_equal(np.asarray(y2), x_host)

    print("KERNEL_OK")
</pallas_src>

<mosaic_0001>
module attributes {stable_mosaic.version = 11 : i64} {
  func.func @_identity_alias_kernel(%arg0: memref<2x8x32xf32, #tpu.memory_space<any>>, %arg1: memref<2x8x32xf32, #tpu.memory_space<any>>) attributes {dimension_semantics = [], scalar_prefetch = 0 : i64, scratch_operands = 0 : i64, tpu.core_type = #tpu.core_type<tc>} {
    return
  }
}

</mosaic_0001>

<bundles_post_ra>
// kernel: identity_map.1
= control target key start
LH: loop header
LB: loop body
LE: loop exit
PB: predicated region body
PF: predicated region fallthrough
CT: control target
= control target key end

     0   :  { %s16_s0 = inlined_call_operand.hbm [shape: f32[2,8,32], index: 0, kind: input, shape index: {}, may-alias: {0,1}]   ;;  %s17_s1 = inlined_call_operand.hbm [shape: f32[2,8,32], index: 1, kind: output, shape index: {}, may-alias: {0,1}]  }

</bundles_post_ra>
